<compile_context>
chip_gen: v5e
topology: v5e:2x2
jax: 0.10.0
libtpu: 0.0.40
codegen_flags: <defaults>
</compile_context>

<pallas_src>
import functools

import jax
import jax.numpy as jnp
from jax.experimental import pallas as pl
from jax.experimental.pallas import tpu as pltpu

LN_EPS = 1e-5
INV_SQRT2 = 0.7071067811865476  # 1/sqrt(2)


def _round_up(n, m):
    return (n + m - 1) // m * m


def _mlp_projector_kernel(x_ref, w1_ref, w2_ref, params_ref, o_ref, *,
                          hidden, token_dim, cross_dim,
                          b1_off, b2_off, gamma_off, beta_off):
    # Activation cast is a no-op when weights are fp32; one VPU op when bf16.
    x = x_ref[...].astype(w1_ref.dtype)

    # Linear 1 (MXU, fp32 accumulate) + bias.
    h = jnp.dot(x, w1_ref[...], preferred_element_type=jnp.float32)
    h = h + params_ref[:, b1_off:b1_off + hidden]

    # Exact GELU (PyTorch nn.GELU default, erf form), computed in fp32.
    h = h * (0.5 * (1.0 + jax.lax.erf(h * INV_SQRT2)))

    # Linear 2 -> (tm, T*D) + bias.
    y = jnp.dot(h.astype(w2_ref.dtype), w2_ref[...],
                preferred_element_type=jnp.float32)
    y = y + params_ref[:, b2_off:b2_off + token_dim]

    # Lane-dense view for LayerNorm / output: (tm, T*D) -> (tm*T, D).
    bt, _ = o_ref.shape
    y = y.reshape(bt, cross_dim)

    # FP32 LayerNorm over cross_attention_dim (biased var, eps inside rsqrt).
    mean = jnp.mean(y, axis=-1, keepdims=True)
    centered = y - mean
    var = jnp.mean(centered * centered, axis=-1, keepdims=True)
    out = centered * jax.lax.rsqrt(var + jnp.float32(LN_EPS))
    out = out * params_ref[:, gamma_off:gamma_off + cross_dim]
    out = out + params_ref[:, beta_off:beta_off + cross_dim]

    o_ref[...] = out.astype(o_ref.dtype)


def make_mlp_image_projector(w1, b1, w2, b2, gamma, beta, *,
                             num_style_tokens, cross_attention_dim,
                             use_bf16_matmul=False, out_dtype=jnp.float32,
                             row_block=128):
    """Build the projector.  Weights are stored (in, out), i.e. transposed vs
    nn.Linear.weight.  All prep (weight casts, param packing) happens ONCE here;
    the returned callable only moves the activation and launches the kernel."""
    F, H = w1.shape
    T, D = num_style_tokens, cross_attention_dim
    TD = T * D
    assert w2.shape == (H, TD)
    assert b1.shape == (H,) and b2.shape == (TD,)
    assert gamma.shape == (D,) and beta.shape == (D,)

    mm_dtype = jnp.bfloat16 if use_bf16_matmul else jnp.float32
    w1_p = jnp.asarray(w1, mm_dtype)
    w2_p = jnp.asarray(w2, mm_dtype)

    # Pack the four fp32 vector params into one lane-padded (1, P) slab.
    segs, offs, cur = [], [], 0
    for v in (b1, b2, gamma, beta):
        v = jnp.asarray(v, jnp.float32).reshape(-1)
        offs.append(cur)
        pad = _round_up(v.shape[0], 128) - v.shape[0]
        segs.append(jnp.pad(v, (0, pad)) if pad else v)
        cur += v.shape[0] + pad
    params = jnp.concatenate(segs).reshape(1, -1)
    b1_off, b2_off, gamma_off, beta_off = offs
    P = params.shape[1]

    kernel = functools.partial(
        _mlp_projector_kernel, hidden=H, token_dim=TD, cross_dim=D,
        b1_off=b1_off, b2_off=b2_off, gamma_off=gamma_off, beta_off=beta_off)

    @jax.jit
    def project(features):
        B = features.shape[0]
        assert features.shape == (B, F)

        # Row-block the batch dim: tiny batches -> single block; large batches
        # -> 128-row blocks split across TensorCores ("parallel").
        tm = B if B <= row_block else row_block
        n_blocks = pl.cdiv(B, tm)

        cost = pl.CostEstimate(
            flops=2 * B * (F * H + H * TD) + 10 * B * TD,
            transcendentals=B * H,
            bytes_accessed=(features.size * features.dtype.itemsize
                            + w1_p.size * w1_p.dtype.itemsize
                            + w2_p.size * w2_p.dtype.itemsize
                            + params.size * 4
                            + B * TD * jnp.dtype(out_dtype).itemsize))

        out_2d = pl.pallas_call(
            kernel,
            out_shape=jax.ShapeDtypeStruct((B * T, D), out_dtype),
            grid=(n_blocks,),
            in_specs=[
                pl.BlockSpec((tm, F), lambda i: (i, 0)),     # activations
                pl.BlockSpec((F, H), lambda i: (0, 0)),      # W1 (resident)
                pl.BlockSpec((H, TD), lambda i: (0, 0)),     # W2 (resident)
                pl.BlockSpec((1, P), lambda i: (0, 0)),      # packed params
            ],
            out_specs=pl.BlockSpec((tm * T, D), lambda i: (i, 0)),
            compiler_params=pltpu.CompilerParams(
                dimension_semantics=("parallel",)),
            cost_estimate=cost,
        )(features, w1_p, w2_p, params)

        # Free metadata reshape outside the kernel.
        return out_2d.reshape(B, T, D)

    return project


# --- pure-JAX reference (fp32 module semantics) ------------------------------

def _reference_fp32(features, w1, b1, w2, b2, gamma, beta, T, D):
    h = features @ w1 + b1
    h = 0.5 * h * (1.0 + jax.lax.erf(h * INV_SQRT2))
    y = h @ w2 + b2
    y = y.reshape(-1, T, D)
    mean = jnp.mean(y, axis=-1, keepdims=True)
    var = jnp.mean((y - mean) ** 2, axis=-1, keepdims=True)
    return (y - mean) * jax.lax.rsqrt(var + LN_EPS) * gamma + beta


if __name__ == "__main__":
    # Small, module-consistent shapes.
    B = 2
    in_features = 32
    mlp_ratio = 1.0
    hidden = int(in_features * mlp_ratio)
    cross_attention_dim = 128
    num_style_tokens = 4

    key = jax.random.PRNGKey(0)
    k_x, k_w1, k_b1, k_w2, k_b2, k_g, k_be = jax.random.split(key, 7)

    features = jax.random.normal(k_x, (B, in_features), dtype=jnp.float32)

    # Weights as (in, out); non-zero biases / non-trivial LN affine to exercise
    # every path (init_weights() would use zeros/ones but forward must handle
    # arbitrary params).
    w1 = 0.02 * jax.random.normal(k_w1, (in_features, hidden), jnp.float32)
    b1 = 0.05 * jax.random.normal(k_b1, (hidden,), jnp.float32)
    w2 = 0.02 * jax.random.normal(
        k_w2, (hidden, cross_attention_dim * num_style_tokens), jnp.float32)
    b2 = 0.05 * jax.random.normal(
        k_b2, (cross_attention_dim * num_style_tokens,), jnp.float32)
    gamma = 1.0 + 0.1 * jax.random.normal(k_g, (cross_attention_dim,), jnp.float32)
    beta = 0.1 * jax.random.normal(k_be, (cross_attention_dim,), jnp.float32)

    ref = _reference_fp32(features, w1, b1, w2, b2, gamma, beta,
                          num_style_tokens, cross_attention_dim)

    # Default path: pure fp32 matmuls (toy shapes -> bf16 buys nothing).
    project = make_mlp_image_projector(
        w1, b1, w2, b2, gamma, beta,
        num_style_tokens=num_style_tokens,
        cross_attention_dim=cross_attention_dim,
        use_bf16_matmul=False)
    out = jax.block_until_ready(project(features))
    assert out.shape == (B, num_style_tokens, cross_attention_dim)
    assert jnp.allclose(out, ref, atol=1e-3, rtol=1e-3), \
        "mismatch vs fp32 JAX reference (fp32 path)"

    # Optional bf16-weight path (for real model sizes); loose tolerance since
    # bf16 rounding of x/W is baked in by design.
    project_bf16 = make_mlp_image_projector(
        w1, b1, w2, b2, gamma, beta,
        num_style_tokens=num_style_tokens,
        cross_attention_dim=cross_attention_dim,
        use_bf16_matmul=True)
    out_bf16 = jax.block_until_ready(project_bf16(features))
    assert jnp.allclose(out_bf16, ref, atol=5e-2, rtol=5e-2), \
        "mismatch vs fp32 JAX reference (bf16 path)"

    print("KERNEL_OK")
</pallas_src>

<mosaic_0001>
module attributes {stable_mosaic.version = 11 : i64} {
  func.func @_mlp_projector_kernel(%arg0: i32, %arg1: memref<2x32xf32, #tpu.memory_space<vmem>>, %arg2: memref<32x32xf32, #tpu.memory_space<vmem>>, %arg3: memref<32x512xf32, #tpu.memory_space<vmem>>, %arg4: memref<1x896xf32, #tpu.memory_space<vmem>>, %arg5: memref<8x128xf32, #tpu.memory_space<vmem>>) attributes {dimension_semantics = [#tpu.dimension_semantics<parallel>], iteration_bounds = array<i64: 1>, scalar_prefetch = 0 : i64, scratch_operands = 0 : i64, tpu.core_type = #tpu.core_type<tc>, window_params = [{transform_indices = @transform_0, window_bounds = array<i64: 2, 32>}, {pipeline_mode = #tpu.pipeline_mode<synchronous>, transform_indices = @transform_1, window_bounds = array<i64: 32, 32>}, {pipeline_mode = #tpu.pipeline_mode<synchronous>, transform_indices = @transform_2, window_bounds = array<i64: 32, 512>}, {pipeline_mode = #tpu.pipeline_mode<synchronous>, transform_indices = @transform_3, window_bounds = array<i64: 1, 896>}, {transform_indices = @transform_4, window_bounds = array<i64: 8, 128>}]} {
    %c0 = arith.constant 0 : index
    %c0_0 = arith.constant 0 : index
    %0 = vector.load %arg1[%c0, %c0_0] : memref<2x32xf32, #tpu.memory_space<vmem>>, vector<2x32xf32>
    %c0_1 = arith.constant 0 : index
    %c0_2 = arith.constant 0 : index
    %1 = vector.load %arg2[%c0_1, %c0_2] : memref<32x32xf32, #tpu.memory_space<vmem>>, vector<32x32xf32>
    %cst = arith.constant dense<0.000000e+00> : vector<2x32xf32>
    %2 = tpu.matmul %0, %1, %cst {dimension_numbers = #tpu.dot_dimension_numbers<[1], [0], [0], [1], [0, 0, 1, 1], [], []>} : vector<2x32xf32>, vector<32x32xf32>, vector<2x32xf32> -> vector<2x32xf32>
    %c0_3 = arith.constant 0 : index
    %c0_4 = arith.constant 0 : index
    %3 = vector.load %arg4[%c0_3, %c0_4] : memref<1x896xf32, #tpu.memory_space<vmem>>, vector<1x32xf32>
    %4 = vector.broadcast %3 : vector<1x32xf32> to vector<2x32xf32>
    %5 = arith.addf %2, %4 : vector<2x32xf32>
    %cst_5 = arith.constant 0.707106769 : f32
    %6 = vector.broadcast %cst_5 : f32 to vector<2x32xf32>
    %7 = arith.mulf %5, %6 : vector<2x32xf32>
    %8 = math.erf %7 : vector<2x32xf32>
    %cst_6 = arith.constant 1.000000e+00 : f32
    %9 = vector.broadcast %cst_6 : f32 to vector<2x32xf32>
    %10 = arith.addf %9, %8 : vector<2x32xf32>
    %cst_7 = arith.constant 5.000000e-01 : f32
    %11 = vector.broadcast %cst_7 : f32 to vector<2x32xf32>
    %12 = arith.mulf %11, %10 : vector<2x32xf32>
    %13 = arith.mulf %5, %12 : vector<2x32xf32>
    %c0_8 = arith.constant 0 : index
    %c0_9 = arith.constant 0 : index
    %14 = vector.load %arg3[%c0_8, %c0_9] : memref<32x512xf32, #tpu.memory_space<vmem>>, vector<32x512xf32>
    %cst_10 = arith.constant dense<0.000000e+00> : vector<2x512xf32>
    %15 = tpu.matmul %13, %14, %cst_10 {dimension_numbers = #tpu.dot_dimension_numbers<[1], [0], [0], [1], [0, 0, 1, 1], [], []>} : vector<2x32xf32>, vector<32x512xf32>, vector<2x512xf32> -> vector<2x512xf32>
    %c0_11 = arith.constant 0 : index
    %c128 = arith.constant 128 : index
    %16 = vector.load %arg4[%c0_11, %c128] : memref<1x896xf32, #tpu.memory_space<vmem>>, vector<1x512xf32>
    %17 = vector.broadcast %16 : vector<1x512xf32> to vector<2x512xf32>
    %18 = arith.addf %15, %17 : vector<2x512xf32>
    %19 = vector.shape_cast %18 : vector<2x512xf32> to vector<8x128xf32>
    %cst_12 = arith.constant dense<0.000000e+00> : vector<8xf32>
    %20 = vector.multi_reduction <add>, %19, %cst_12 [1] : vector<8x128xf32> to vector<8xf32>
    %21 = vector.shape_cast %20 : vector<8xf32> to vector<8x1xf32>
    %cst_13 = arith.constant 1.280000e+02 : f32
    %22 = vector.broadcast %cst_13 : f32 to vector<8x1xf32>
    %23 = arith.divf %21, %22 : vector<8x1xf32>
    %24 = vector.broadcast %23 : vector<8x1xf32> to vector<8x128xf32>
    %25 = arith.subf %19, %24 : vector<8x128xf32>
    %26 = arith.mulf %25, %25 : vector<8x128xf32>
    %cst_14 = arith.constant dense<0.000000e+00> : vector<8xf32>
    %27 = vector.multi_reduction <add>, %26, %cst_14 [1] : vector<8x128xf32> to vector<8xf32>
    %28 = vector.shape_cast %27 : vector<8xf32> to vector<8x1xf32>
    %cst_15 = arith.constant 1.280000e+02 : f32
    %29 = vector.broadcast %cst_15 : f32 to vector<8x1xf32>
    %30 = arith.divf %28, %29 : vector<8x1xf32>
    %cst_16 = arith.constant 9.99999974E-6 : f32
    %31 = vector.broadcast %cst_16 : f32 to vector<8x1xf32>
    %32 = arith.addf %30, %31 : vector<8x1xf32>
    %33 = math.rsqrt %32 : vector<8x1xf32>
    %34 = vector.broadcast %33 : vector<8x1xf32> to vector<8x128xf32>
    %35 = arith.mulf %25, %34 : vector<8x128xf32>
    %c0_17 = arith.constant 0 : index
    %c640 = arith.constant 640 : index
    %36 = vector.load %arg4[%c0_17, %c640] : memref<1x896xf32, #tpu.memory_space<vmem>>, vector<1x128xf32>
    %37 = vector.broadcast %36 : vector<1x128xf32> to vector<8x128xf32>
    %38 = arith.mulf %35, %37 : vector<8x128xf32>
    %c0_18 = arith.constant 0 : index
    %c768 = arith.constant 768 : index
    %39 = vector.load %arg4[%c0_18, %c768] : memref<1x896xf32, #tpu.memory_space<vmem>>, vector<1x128xf32>
    %40 = vector.broadcast %39 : vector<1x128xf32> to vector<8x128xf32>
    %41 = arith.addf %38, %40 : vector<8x128xf32>
    %c0_19 = arith.constant 0 : index
    %c0_20 = arith.constant 0 : index
    %42 = vector.load %arg5[%c0_19, %c0_20] : memref<8x128xf32, #tpu.memory_space<vmem>>, vector<8x128xf32>
    tpu.vector_store %arg5[%c0_19, %c0_20], %41 {strides = array<i32>} : memref<8x128xf32, #tpu.memory_space<vmem>>, vector<8x128xf32>,
    return
  }
  func.func @transform_0(%arg0: i32) -> (i32, i32) {
    %c0_i32 = arith.constant 0 : i32
    %c0_i32_0 = arith.constant 0 : i32
    return %arg0, %c0_i32 : i32, i32
  }
  func.func @transform_1(%arg0: i32) -> (i32, i32) {
    %c0_i32 = arith.constant 0 : i32
    %c0_i32_0 = arith.constant 0 : i32
    %c0_i32_1 = arith.constant 0 : i32
    return %c0_i32, %c0_i32_0 : i32, i32
  }
  func.func @transform_2(%arg0: i32) -> (i32, i32) {
    %c0_i32 = arith.constant 0 : i32
    %c0_i32_0 = arith.constant 0 : i32
    %c0_i32_1 = arith.constant 0 : i32
    return %c0_i32, %c0_i32_0 : i32, i32
  }
  func.func @transform_3(%arg0: i32) -> (i32, i32) {
    %c0_i32 = arith.constant 0 : i32
    %c0_i32_0 = arith.constant 0 : i32
    %c0_i32_1 = arith.constant 0 : i32
    return %c0_i32, %c0_i32_0 : i32, i32
  }
  func.func @transform_4(%arg0: i32) -> (i32, i32) {
    %c0_i32 = arith.constant 0 : i32
    %c0_i32_0 = arith.constant 0 : i32
    return %arg0, %c0_i32 : i32, i32
  }
}

</mosaic_0001>

<bundles_post_ra>
// kernel: project.1
= control target key start
LH: loop header
LB: loop body
LE: loop exit
PB: predicated region body
PF: predicated region fallthrough
CT: control target
= control target key end

     0   :  { %9 = vsyncpa [#allocation3], 0  ;;  %s557_s0 = inlined_call_operand.hbm [shape: f32[2,32], index: 0, kind: input, shape index: {}]   ;;  %s558_s1 = inlined_call_operand.hbm [shape: f32[32,32], index: 1, kind: input, shape index: {}]   ;;  %s559_s2 = inlined_call_operand.hbm [shape: f32[32,512], index: 2, kind: input, shape index: {}]   ;;  %s560_s3 = inlined_call_operand.hbm [shape: f32[1,896], index: 3, kind: input, shape index: {}]   ;;  %s561_s4 = inlined_call_operand.hbm [shape: f32[8,128], index: 4, kind: output, shape index: {}]  }
   0x1   :  { %10 = vsyncpa [#allocation6], 0 }
   0x2   :  { %11 = vsyncpa [#allocation9], 0  ;;  %s28_s17 = sshll.u32 %s558_s1, 4  ;;  %s29_s17 = int_to_ptr.hbm [resolvable:$true] %s28_s17 }
   0x3   :  { %12 = vsyncpa [#allocation4], 0  ;;  %s492_s18 = smov [#allocation5]   ;;  %s18_s22 = sshll.u32 %s557_s0, 4  ;;  %s19_s22 = int_to_ptr.hbm [resolvable:$true] %s18_s22 }
   0x4   :  { %s30_s19 = sshll.u32 %s492_s18, 4  ;;  %s493_s23 = smov 128   ;;  %s31_s19 = int_to_ptr.vmem [resolvable:$true] %s30_s19 }
   0x5   :  { %s494_s24 = smov 8   ;;  %s495_s25 = smov [#allocation2]  }
   0x6   :  { %36 = dma.hbm_to_vmem [thread:$0]  %s29_s17, 512, %s31_s19, [#allocation6], %s493_s23, %s493_s23, %s494_s24  }
   0x7   :  { %s20_s26 = sshll.u32 %s495_s25, 4  ;;  %s41_s29 = sshll.u32 %s559_s2, 4  ;;  %s21_s26 = int_to_ptr.vmem [resolvable:$true] %s20_s26  ;;  %s42_s29 = int_to_ptr.hbm [resolvable:$true] %s41_s29 }
   0x8   :  { %23 = dma.hbm_to_vmem [thread:$0]  %s19_s22, 32, %s21_s26, [#allocation3]  }
   0x9   :  { %s496_s1 = smov [#allocation7]   ;;  %s55_s0 = sshll.u32 %s560_s3, 4  ;;  %s56_s0 = int_to_ptr.hbm [resolvable:$true] %s55_s0 }
   0xa   :  { %s43_s30 = sshll.u32 %s496_s1, 4  ;;  %s497_s7 = smov 512   ;;  %s44_s30 = int_to_ptr.vmem [resolvable:$true] %s43_s30 }
   0xb   :  { %s498_s8 = smov 32   ;;  %s499_s9 = smov [#allocation8]  }
   0xc   :  { %49 = dma.hbm_to_vmem [thread:$0]  %s42_s29, 2048, %s44_s30, [#allocation6], %s497_s7, %s497_s7, %s498_s8  }
   0xd   :  { %s57_s10 = sshll.u32 %s499_s9, 4  ;;  %s58_s10 = int_to_ptr.vmem [resolvable:$true] %s57_s10 }
   0xe   :  { %60 = dma.hbm_to_vmem [thread:$0]  %s56_s0, 112, %s58_s10, [#allocation9]  }
   0xf   :  { %484 = dma.done.wait [#allocation3], 32  }
  0x10   :  { %485 = vsyncadd [#allocation3], 4294967264 }
  0x11   :  { %486 = dma.done.wait [#allocation6], 2560  }
  0x12   :  { %487 = vsyncadd [#allocation6], 4294964736 }
  0x13   :  { %488 = dma.done.wait [#allocation9], 112  }
  0x14   :  { %489 = vsyncadd [#allocation9], 4294967184  ;;  %v81_v0 = vld [vmem:[#allocation5 + $0x18] sm:$0xff]  ;;  %v80_v1 = vld [vmem:[#allocation5 + $0x10] sm:$0xff]  ;;  %vm86_vm0 = vcmask 261120   ;;  %vm270_vm5 = vcmask 1041408  }
  0x15   :  { %102 = vmatpush.msra.mxu0 %v81_v0  ;;  %v79_v2 = vld [vmem:[#allocation5 + $0x8] sm:$0xff]  ;;  %v78_v3 = vld [vmem:[#allocation5] sm:$0xff]  ;;  %v77_v4 = vld [vmem:[#allocation2] sm:$0x3]  ;;  %vm272_vm6 = vcmask 1045508   ;;  %vm274_vm7 = vcmask 1043456  }
  0x16   :  { %v355_v5 = vld [vmem:[#allocation8] ss:$0 sm:$0xff]  ;;  %v167_v21 = vld [vmem:[#allocation7 + $0x68] sm:$0xff]  ;;  %v168_v22 = vld [vmem:[#allocation7 + $0x70] sm:$0xff]  ;;  %s502_s2 = smov [#allocation10]   ;;  %s326_s13 = sshll.u32 %s561_s4, 4  ;;  %s327_s13 = int_to_ptr.hbm [resolvable:$true] %s326_s13 }
  0x17   :  { %103 = vmatpush.msra.mxu0 %v80_v1  ;;  %v166_v20 = vld [vmem:[#allocation7 + $0x60] sm:$0xff]  ;;  %215 = vmatpush.msra.mxu2 %v167_v21  ;;  %v169_v23 = vld [vmem:[#allocation7 + $0x78] sm:$0xff]  ;;  %v163_v26 = vld [vmem:[#allocation7 + $0x48] sm:$0xff]  ;;  %s324_s3 = sshll.u32 %s502_s2, 4  ;;  %s325_s3 = int_to_ptr.vmem [resolvable:$true] %s324_s3 }
  0x18   :  { %195 = vmatpush.msra.mxu1 %v166_v20  ;;  %235 = vmatpush.msra.mxu3 %v168_v22  ;;  %v162_v25 = vld [vmem:[#allocation7 + $0x40] sm:$0xff]  ;;  %v164_v28 = vld [vmem:[#allocation7 + $0x50] sm:$0xff]  ;;  %v165_v29 = vld [vmem:[#allocation7 + $0x58] sm:$0xff]  ;;  %v501_v22 = vmov 128.0  }
  0x19   :  { %104 = vmatpush.msra.mxu0 %v79_v2  ;;  %216 = vmatpush.msra.mxu2 %v163_v26  ;;  %v158_v31 = vld [vmem:[#allocation7 + $0x20] sm:$0xff]  ;;  %v159_v32 = vld [vmem:[#allocation7 + $0x28] sm:$0xff]  ;;  %v160_v33 = vld [vmem:[#allocation7 + $0x30] sm:$0xff] }
  0x1a   :  { %196 = vmatpush.msra.mxu1 %v162_v25  ;;  %236 = vmatpush.msra.mxu3 %v164_v28  ;;  %v161_v34 = vld [vmem:[#allocation7 + $0x38] sm:$0xff]  ;;  %v154_v35 = vld [vmem:[#allocation7] sm:$0xff]  ;;  %v155_v36 = vld [vmem:[#allocation7 + $0x8] sm:$0xff] }
  0x1b   :  { %105 = vmatpush.msra.mxu0 %v78_v3  ;;  %217 = vmatpush.msra.mxu2 %v159_v32  ;;  %v156_v38 = vld [vmem:[#allocation7 + $0x10] sm:$0xff]  ;;  %v157_v39 = vld [vmem:[#allocation7 + $0x18] sm:$0xff]  ;;  %v170_v63 = vld [vmem:[#allocation8 + $0x1] sm:$0xf] }
  0x1c   :  { %338 = vmatmul.msk.f32.vlgmr.msra.gmra.mxu0 %vm86_vm0, %v77_v4  ;;  %197 = vmatpush.msra.mxu1 %v158_v31  ;;  %v175_v0 = vperm.slane %v170_v63, 3  ;;  %v173_v2 = vperm.slane %v170_v63, 1  ;;  %v174_v3 = vperm.slane %v170_v63, 2  ;;  %v172_v4 = vperm.slane %v170_v63, 0 }
  0x1d   :  { %255 = vmatpush.msrb.mxu0 %v169_v23  ;;  %237 = vmatpush.msra.mxu3 %v160_v33 }
  0x1e   :  { %198 = vmatpush.msra.mxu1 %v154_v35  ;;  %218 = vmatpush.msra.mxu2 %v155_v36 }
  0x1f   :  { %256 = vmatpush.msrb.mxu0 %v165_v29  ;;  %238 = vmatpush.msra.mxu3 %v156_v38 }
  0x21   :  { %257 = vmatpush.msrb.mxu0 %v161_v34 }
  0x23   :  { %258 = vmatpush.msrb.mxu0 %v157_v39 }
  0x99   :  { %v107_v6 = vpop.f32.mrf.mxu0 }
  0x9a   :  { %v541_v7 = vadd.f32 %v355_v5, %v107_v6 }
  0x9c   :  { %v544_v8 = vmul.f32 0.70710677, %v541_v7 }
  0x9e   :  { %v111_v9 = vmul.f32 %v544_v8, %v544_v8 }
  0xa0   :  { %v112_v10 = vmin.f32 %v111_v9, 16.0  ;;  %v500_v9 = vmov 1966171168  }
  0xa2   :  { %v113_v11 = vmul.f32 2.1237322e-06, %v112_v10  ;;  %v124_v12 = vmul.f32 3.8918573e-05, %v112_v10 }
  0xa4   :  { %v114_v13 = vadd.f32 0.00028619796, %v113_v11  ;;  %v125_v14 = vadd.f32 0.001143296, %v124_v12 }
  0xa6   :  { %v115_v15 = vmul.f32 %v114_v13, %v112_v10  ;;  %v126_v16 = vmul.f32 %v125_v14, %v112_v10 }
  0xa8   :  { %v127_v17 = vadd.f32 0.014752088, %v126_v16  ;;  %v116_v18 = vadd.f32 0.0036580483, %v115_v15 }
  0xaa   :  { %v128_v19 = vmul.f32 %v127_v17, %v112_v10  ;;  %v117_v27 = vmul.f32 %v116_v18, %v112_v10 }
  0xac   :  { %v129_v24 = vadd.f32 0.112945676, %v128_v19  ;;  %v118_v40 = vadd.f32 0.05243302, %v117_v27 }
  0xae   :  { %v130_v30 = vmul.f32 %v129_v24, %v112_v10  ;;  %v119_v43 = vmul.f32 %v118_v40, %v112_v10 }
  0xb0   :  { %v131_v37 = vadd.f32 0.4994258, %v130_v30  ;;  %v120_v44 = vadd.f32 0.18741608, %v119_v43 }
  0xb2   :  { %v132_v41 = vmul.f32 %v131_v37, %v112_v10  ;;  %v121_v46 = vmul.f32 %v120_v44, %v112_v10  ;;  %v278_v10 = vunpack.c.l.s4 %v500_v9 }
  0xb4   :  { %v133_v42 = vadd.f32 1.0, %v132_v41  ;;  %v122_v50 = vadd.f32 1.1283791, %v121_v46  ;;  %v279_v17 = vunpack.c.0.s8 %v278_v10 }
  0xb6   :  { %358 = vrcp.f32 %v133_v42  ;;  %v145_v49 = vand.u32 2147483648, %v133_v42  ;;  %v143_v52 = vand.u32 2147483647, %v133_v42  ;;  %vm139_vm2 = vweird.f32 %v133_v42 }
  0xb7   :  { %v123_v55 = vmul.f32 %v122_v50, %v544_v8  ;;  %360 = vrcp.f32 %v501_v22 }
  0xb8   :  { %v146_v54 = vor.u32 1.1754944e-38, %v145_v49  ;;  %vm144_vm4 = vcmp.eq.f32.partialorder %v143_v52, 8.507059e+37 }
  0xbc   :  { %v359_v45 = vpop.eup %358 }
  0xbd   :  { %v135_v47 = vmul.f32 %v359_v45, %v133_v42  ;;  %vm140_vm1 = vweird.f32 %v359_v45  ;;  %v361_v23 = vpop.eup %360  ;;  %v356_v42 = vld [vmem:[#allocation8 + $0x5] ss:$0 sm:$0xff] }
  0xbe   :  { %vm141_vm3 = vmor %vm139_vm2, %vm140_vm1  ;;  %v284_v24 = vmul.f32 128.0, %v361_v23  ;;  %vm288_vm8 = vweird.f32 %v361_v23 }
  0xbf   :  { %v136_v48 = vsub.f32 1.0, %v135_v47 }
  0xc0   :  { %v285_v25 = vsub.f32 1.0, %v284_v24 }
  0xc1   :  { %v137_v51 = vmul.f32 %v359_v45, %v136_v48 }
  0xc2   :  { %v286_v26 = vmul.f32 %v361_v23, %v285_v25 }
  0xc3   :  { %v138_v53 = vadd.f32 %v359_v45, %v137_v51 }
  0xc4   :  { %v287_v27 = vadd.f32 %v361_v23, %v286_v26 }
  0xc5   :  { %v142_v56 = vsel %vm141_vm3, %v359_v45, %v138_v53  ;;  %v357_v45 = vld [vmem:[#allocation8 + $0x6] ss:$0 sm:$0xff] }
  0xc6   :  { %v147_v57 = vsel %vm144_vm4, %v146_v54, %v142_v56  ;;  %v289_v28 = vsel %vm288_vm8, %v361_v23, %v287_v27 }
  0xc7   :  { %v148_v58 = vmul.f32 %v147_v57, %v123_v55 }
  0xc9   :  { %v339_v59 = vclamps-f32 %v148_v58, 1.0 }
  0xcb   :  { %v151_v60 = vadd.f32 1.0, %v339_v59 }
  0xcd   :  { %v152_v61 = vmul.f32 0.5, %v151_v60 }
  0xcf   :  { %v153_v62 = vmul.f32 %v152_v61, %v541_v7 }
  0xd1   :  { %340 = vmatmul.msk.f32.vlgmr.msra.gmra.mxu1 %vm86_vm0, %v153_v62  ;;  %341 = vmatmul.msk.f32.vlgmr.msra.gmra.mxu2 %vm86_vm0, %v153_v62 }
  0xd2   :  { %342 = vmatmul.msk.f32.vlgmr.msra.gmra.mxu3 %vm86_vm0, %v153_v62  ;;  %343 = vmatmul.msk.f32.vlgmr.msrb.gmra.mxu0 %vm86_vm0, %v153_v62 }
 0x14e   :  { %v200_v5 = vpop.f32.mrf.mxu1 }
 0x14f   :  { %v260_v1 = vpop.f32.mrf.mxu0  ;;  %v201_v13 = vadd.f32 %v200_v5, %v172_v4 }
 0x150   :  { %v261_v6 = vadd.f32 %v260_v1, %v175_v0 }
 0x152   :  { %v269_v15 = vrot.slane %v261_v6, 2 }
 0x154   :  { %v220_v8 = vpop.f32.mrf.mxu2 }
 0x155   :  { %v221_v7 = vadd.f32 %v220_v8, %v173_v2  ;;  %v240_v11 = vpop.f32.mrf.mxu3 }
 0x156   :  { %v241_v12 = vadd.f32 %v240_v11, %v174_v3 }
 0x157   :  { %v267_v14 = vrot.slane %v221_v7, 6 }
 0x158   :  { %v268_v16 = vrot.slane %v241_v12, 4 }
 0x159   :  { %v271_v18 = vsel %vm270_vm5, %v201_v13, %v267_v14 }
 0x15a   :  { %v273_v19 = vsel %vm272_vm6, %v268_v16, %v269_v15 }
 0x15b   :  { %v275_v20 = vsel %vm274_vm7, %v271_v18, %v273_v19 }
 0x15c   :  { %v280_v21 = vperm.slane %v275_v20, %v279_v17 }
 0x15e   :  { %281 = vadd.xlane.f32.xlu0 %v280_v21 }
 0x1d1   :  { %v282_v29 = vpop.xlane.xlu0 %281 }
 0x1d2   :  { %v290_v30 = vmul.f32 %v289_v28, %v282_v29 }
 0x1d4   :  { %v291_v31 = vsub.f32 %v280_v21, %v290_v30 }
 0x1d6   :  { %v292_v32 = vmul.f32 %v291_v31, %v291_v31 }
 0x1d8   :  { %293 = vadd.xlane.f32.xlu0 %v292_v32 }
 0x24b   :  { %v294_v33 = vpop.xlane.xlu0 %293 }
 0x24c   :  { %v295_v34 = vmul.f32 %v294_v33, %v289_v28 }
 0x24e   :  { %v296_v35 = vadd.f32 1e-05, %v295_v34 }
 0x250   :  { %362 = vrsqrt.f32 %v296_v35  ;;  %vm303_vm10 = vweird.f32 %v296_v35 }
 0x256   :  { %v363_v36 = vpop.eup %362 }
 0x257   :  { %v298_v37 = vmul.f32 %v363_v36, %v296_v35  ;;  %vm304_vm9 = vweird.f32 %v363_v36 }
 0x258   :  { %vm305_vm11 = vmor %vm303_vm10, %vm304_vm9 }
 0x259   :  { %v299_v38 = vmul.f32 %v363_v36, %v298_v37 }
 0x25b   :  { %v300_v39 = vmul.f32 0.5, %v299_v38 }
 0x25d   :  { %v301_v40 = vsub.f32 1.5, %v300_v39 }
 0x25f   :  { %v302_v41 = vmul.f32 %v363_v36, %v301_v40 }
 0x261   :  { %v306_v43 = vsel %vm305_vm11, %v363_v36, %v302_v41 }
 0x262   :  { %v307_v44 = vmul.f32 %v306_v43, %v291_v31 }
 0x264   :  { %v312_v46 = vmul.f32 %v356_v42, %v307_v44 }
 0x266   :  { %v317_v47 = vadd.f32 %v357_v45, %v312_v46 }
 0x268   :  { %318 = vst [vmem:[#allocation10] sm:$0xff] %v317_v47 }
 0x269   :  { %329 = dma.vmem_to_hbm [thread:$0]  %s325_s3, 128, %s327_s13, [#allocation4]  }
 0x26a   :  { %490 = dma.done.wait [#allocation4], 128  }
 0x26b   :  { %491 = vsyncadd [#allocation4], 4294967168 }
 0x26c   :  { %334 = vsyncpa [#allocation3], 1 }
 0x26d   :  { %335 = vsyncpa [#allocation6], 1 }
 0x26e   :  { %336 = vsyncpa [#allocation9], 1 }
 0x26f   :  { %337 = vsyncpa [#allocation4], 1 }

</bundles_post_ra>
